<compile_context>
chip_gen: v7x
topology: tpu7x:2x2x1
jax: 0.10.0
libtpu: 0.0.40
codegen_flags: <defaults>
</compile_context>

<pallas_src>
import functools

import jax
import jax.numpy as jnp
from jax import lax
from jax.experimental import pallas as pl
from jax.experimental.pallas import tpu as pltpu

_LANE = 128
_SUBLANE = 8


def _dice_sums_kernel(y_pred_ref, y_true_ref, inter_ref, sump_ref, sumt_ref,
                      inter_acc, sump_acc, sumt_acc,
                      *, tile_h, tiles_per_split, height, masked):
    s = pl.program_id(2)

    @pl.when(s == 0)
    def _init():
        inter_acc[...] = jnp.zeros_like(inter_acc)
        sump_acc[...] = jnp.zeros_like(sump_acc)
        sumt_acc[...] = jnp.zeros_like(sumt_acc)

    logits = y_pred_ref[0].astype(jnp.float32)      # (C, TH, W)
    labels = y_true_ref[0].astype(jnp.int32)        # (TH, W), widened in-kernel

    # Numerically stable softmax over the class axis (leading axis -> pure VPU
    # elementwise work across per-class vreg planes; no cross-lane shuffles).
    m = jnp.max(logits, axis=0, keepdims=True)
    e = jnp.exp(logits - m)
    denom = jnp.sum(e, axis=0, keepdims=True)
    p = e / denom                                    # exact (approx recip drifted ~3e-5)

    # Boolean "one-hot": never materialized as a float tensor.
    class_ids = lax.broadcasted_iota(jnp.int32, logits.shape, 0)
    hit = class_ids == labels[None, :, :]

    if masked:
        # Rows past the true image height (ragged last tile or duplicated
        # clamped tiles) hold garbage logits/labels: knock them out via selects.
        tile_idx = pl.program_id(0) * tiles_per_split + s
        row0 = tile_idx * tile_h
        row_ids = row0 + lax.broadcasted_iota(jnp.int32, labels.shape, 0)
        valid = (row_ids < height)[None, :, :]
        hit = jnp.logical_and(hit, valid)
        p_for_sum = jnp.where(valid, p, 0.0)
    else:
        p_for_sum = p

    # Per-step reduction only over the row (sublane) axis; accumulators stay
    # lane-resident (C, 1, W).  Cross-lane reduce is deferred to finalize.
    inter_acc[...] += jnp.sum(jnp.where(hit, p, 0.0), axis=1, keepdims=True)
    sumt_acc[...] += jnp.sum(jnp.where(hit, 1.0, 0.0), axis=1, keepdims=True)
    sump_acc[...] += jnp.sum(p_for_sum, axis=1, keepdims=True)

    @pl.when(s == pl.num_programs(2) - 1)
    def _finalize():
        inter_ref[0, 0] = jnp.sum(inter_acc[...], axis=2)   # (C, 1)
        sump_ref[0, 0] = jnp.sum(sump_acc[...], axis=2)
        sumt_ref[0, 0] = jnp.sum(sumt_acc[...], axis=2)


def weight_dice_loss(y_pred, y_true, weight=None, eps=1e-7,
                     tile_h=None, splits=None,
                     vmem_budget_bytes=40 * 1024 * 1024):
    """Weighted Dice loss.  y_pred: (N, C, H, W) logits; y_true: (N, H, W) labels."""
    N, C, H, W = y_pred.shape
    assert y_true.shape == (N, H, W), (y_pred.shape, y_true.shape)

    # Keep labels at their native (possibly narrow) integer width.
    if (not jnp.issubdtype(y_true.dtype, jnp.integer)) or jnp.dtype(y_true.dtype).itemsize > 4:
        y_true = y_true.astype(jnp.int32)

    itemsize = jnp.dtype(y_pred.dtype).itemsize
    lbl_itemsize = jnp.dtype(y_true.dtype).itemsize
    w_pad = -(-W // _LANE) * _LANE          # lane-padded width (VMEM footprint only)

    # Rows per spatial tile from a VMEM budget: 2x double-buffered logits block,
    # 2x labels block, ~6 full-tile f32 temporaries inside the kernel body.
    per_row = C * w_pad * (2 * itemsize + 6 * 4) + 2 * w_pad * lbl_itemsize
    if tile_h is None:
        tile_h = max(_SUBLANE, vmem_budget_bytes // per_row)
    tile_h = int(min(H, tile_h))
    if tile_h < H:
        tile_h = max(_SUBLANE, (tile_h // _SUBLANE) * _SUBLANE)
    # TODO(synk): for extreme C*W (where even an 8-row tile blows the budget) the
    # W axis would also need tiling; not needed for typical segmentation shapes.

    num_tiles = -(-H // tile_h)
    if splits is None:
        # Give v7x's 2nd TensorCore work when the batch can't; same total tiles,
        # so it is harmless on single-core v5e/v6e.
        splits = 2 if (N == 1 and num_tiles >= 2) else 1
    splits = max(1, min(int(splits), num_tiles))
    tiles_per_split = -(-num_tiles // splits)
    masked = splits * tiles_per_split * tile_h > H

    def _tile_index(sp, s):
        t = sp * tiles_per_split + s
        if splits * tiles_per_split > num_tiles:
            # Duplicated trailing tiles are fully row-masked in the kernel; clamp
            # the block index so the DMA never targets a fully out-of-range block.
            t = jnp.minimum(t, num_tiles - 1)
        return t

    pred_spec = pl.BlockSpec((1, C, tile_h, W),
                             lambda sp, n, s: (n, 0, _tile_index(sp, s), 0))
    lbl_spec = pl.BlockSpec((1, tile_h, W),
                            lambda sp, n, s: (n, _tile_index(sp, s), 0))
    out_spec = pl.BlockSpec((1, 1, C, 1), lambda sp, n, s: (sp, n, 0, 0))

    th_pad = -(-tile_h // _SUBLANE) * _SUBLANE
    f32_blk = C * th_pad * w_pad * 4
    est = (2 * C * th_pad * w_pad * itemsize
           + 2 * max(th_pad, 32) * w_pad * lbl_itemsize
           + 6 * f32_blk + 3 * C * w_pad * 4 + (1 << 20))
    vmem_limit = int(min(48 * 1024 * 1024, max(32 * 1024 * 1024, est)))

    cost = pl.CostEstimate(
        flops=10 * N * C * H * W,
        transcendentals=N * C * H * W,
        bytes_accessed=itemsize * N * C * H * W + lbl_itemsize * N * H * W
        + 3 * 4 * splits * N * C,
    )

    kernel = functools.partial(_dice_sums_kernel, tile_h=tile_h,
                               tiles_per_split=tiles_per_split, height=H,
                               masked=masked)

    part_shape = jax.ShapeDtypeStruct((splits, N, C, 1), jnp.float32)
    inter, sum_p, sum_t = pl.pallas_call(
        kernel,
        out_shape=(part_shape, part_shape, part_shape),
        grid_spec=pltpu.PrefetchScalarGridSpec(
            num_scalar_prefetch=0,
            grid=(splits, N, tiles_per_split),
            in_specs=[pred_spec, lbl_spec],
            out_specs=[out_spec, out_spec, out_spec],
            scratch_shapes=[pltpu.VMEM((C, 1, W), jnp.float32)] * 3,
        ),
        compiler_params=pltpu.CompilerParams(
            dimension_semantics=("parallel", "parallel", "arbitrary"),
            vmem_limit_bytes=vmem_limit,
        ),
        cost_estimate=cost,
    )(y_pred, y_true)

    # Tiny exact epilogue: combine split partials, form Dice, weight, mean.
    inter = jnp.sum(inter[..., 0], axis=0)     # (N, C)
    sum_p = jnp.sum(sum_p[..., 0], axis=0)
    sum_t = jnp.sum(sum_t[..., 0], axis=0)
    dice = (2.0 * inter + eps) / (sum_p + sum_t + eps)
    w = jnp.ones((C,), jnp.float32) if weight is None else jnp.asarray(weight, jnp.float32)
    return 1.0 - jnp.mean(dice * w[None, :])


def _reference_loss(y_pred, y_true, weight=None, eps=1e-7):
    # Pure-JAX reference mirroring the PyTorch forward.
    p = jax.nn.softmax(y_pred.astype(jnp.float32), axis=1)
    C = y_pred.shape[1]
    oh = jax.nn.one_hot(y_true.astype(jnp.int32), C, dtype=jnp.float32)  # (N,H,W,C)
    oh = jnp.transpose(oh, (0, 3, 1, 2))                                 # (N,C,H,W)
    inter = jnp.sum(p * oh, axis=(2, 3))
    union = jnp.sum(p, axis=(2, 3)) + jnp.sum(oh, axis=(2, 3))
    dice = (2.0 * inter + eps) / (union + eps)
    w = jnp.ones((C,), jnp.float32) if weight is None else jnp.asarray(weight, jnp.float32)
    return 1.0 - jnp.mean(dice * w[None, :])


if __name__ == "__main__":
    key = jax.random.PRNGKey(0)

    # Test 1: module-default 3-class problem; tile covers the whole plane.
    k1, k2, key = jax.random.split(key, 3)
    N, C, H, W = 2, 3, 16, 16
    y_pred = jax.random.normal(k1, (N, C, H, W), dtype=jnp.float32)
    y_true = jax.random.randint(k2, (N, H, W), 0, C, dtype=jnp.int32)
    weight = jnp.array([1.0, 1.0, 1.0], dtype=jnp.float32)   # module default [1, 1, 1]
    loss = jax.block_until_ready(weight_dice_loss(y_pred, y_true, weight))
    ref = _reference_loss(y_pred, y_true, weight)
    assert jnp.allclose(loss, ref, atol=2e-5, rtol=2e-5), (loss, ref)

    # Test 2: ragged H (50 % 16 != 0), multi-tile reduction, 2-way spatial split,
    # exercises the in-kernel row masking and the resident accumulators.
    k1, k2, key = jax.random.split(key, 3)
    N2, C2, H2, W2 = 1, 4, 50, 50
    y_pred2 = jax.random.normal(k1, (N2, C2, H2, W2), dtype=jnp.float32)
    y_true2 = jax.random.randint(k2, (N2, H2, W2), 0, C2, dtype=jnp.int32)
    weight2 = jnp.arange(1, C2 + 1, dtype=jnp.float32) / C2
    loss2 = jax.block_until_ready(weight_dice_loss(y_pred2, y_true2, weight2, tile_h=16))
    ref2 = _reference_loss(y_pred2, y_true2, weight2)
    assert jnp.allclose(loss2, ref2, atol=2e-5, rtol=2e-5), (loss2, ref2)

    # Test 3: narrow (int8) labels + 3-way split with clamped duplicate tiles.
    k1, k2, key = jax.random.split(key, 3)
    N3, C3, H3, W3 = 1, 3, 50, 50
    y_pred3 = jax.random.normal(k1, (N3, C3, H3, W3), dtype=jnp.float32)
    y_true3 = jax.random.randint(k2, (N3, H3, W3), 0, C3, dtype=jnp.int32).astype(jnp.int8)
    loss3 = jax.block_until_ready(
        weight_dice_loss(y_pred3, y_true3, None, tile_h=16, splits=3))
    ref3 = _reference_loss(y_pred3, y_true3, None)
    assert jnp.allclose(loss3, ref3, atol=2e-5, rtol=2e-5), (loss3, ref3)

    print("KERNEL_OK")
</pallas_src>

<mosaic_0001>
module attributes {stable_mosaic.version = 11 : i64} {
  func.func @_dice_sums_kernel(%arg0: i32, %arg1: i32, %arg2: i32, %arg3: memref<1x3x16x16xf32, #tpu.memory_space<vmem>>, %arg4: memref<1x16x16xi32, #tpu.memory_space<vmem>>, %arg5: memref<1x1x3x1xf32, #tpu.memory_space<vmem>>, %arg6: memref<1x1x3x1xf32, #tpu.memory_space<vmem>>, %arg7: memref<1x1x3x1xf32, #tpu.memory_space<vmem>>, %arg8: memref<3x1x16xf32, #tpu.memory_space<vmem>>, %arg9: memref<3x1x16xf32, #tpu.memory_space<vmem>>, %arg10: memref<3x1x16xf32, #tpu.memory_space<vmem>>) attributes {dimension_semantics = [#tpu.dimension_semantics<parallel>, #tpu.dimension_semantics<parallel>, #tpu.dimension_semantics<arbitrary>], iteration_bounds = array<i64: 1, 2, 1>, scalar_prefetch = 0 : i64, scratch_operands = 3 : i64, tpu.core_type = #tpu.core_type<tc>, window_params = [{transform_indices = @transform_0, window_bounds = array<i64: 1, 3, 16, 16>}, {transform_indices = @transform_1, window_bounds = array<i64: 1, 16, 16>}, {transform_indices = @transform_2, window_bounds = array<i64: 1, 1, 3, 1>}, {transform_indices = @transform_3, window_bounds = array<i64: 1, 1, 3, 1>}, {transform_indices = @transform_4, window_bounds = array<i64: 1, 1, 3, 1>}]} {
    %c0_i32 = arith.constant 0 : i32
    %0 = arith.cmpi eq, %arg2, %c0_i32 : i32
    %1 = arith.extui %0 : i1 to i32
    %c0_i32_0 = arith.constant 0 : i32
    %2 = arith.cmpi ne, %1, %c0_i32_0 : i32
    scf.if %2 {
      %cst_34 = arith.constant 0.000000e+00 : f32
      %43 = vector.broadcast %cst_34 : f32 to vector<3x1x16xf32>
      %c0_35 = arith.constant 0 : index
      %c0_36 = arith.constant 0 : index
      %c0_37 = arith.constant 0 : index
      %44 = vector.load %arg8[%c0_35, %c0_36, %c0_37] : memref<3x1x16xf32, #tpu.memory_space<vmem>>, vector<3x1x16xf32>
      tpu.vector_store %arg8[%c0_35, %c0_36, %c0_37], %43 {strides = array<i32>} : memref<3x1x16xf32, #tpu.memory_space<vmem>>, vector<3x1x16xf32>,
      %cst_38 = arith.constant 0.000000e+00 : f32
      %45 = vector.broadcast %cst_38 : f32 to vector<3x1x16xf32>
      %c0_39 = arith.constant 0 : index
      %c0_40 = arith.constant 0 : index
      %c0_41 = arith.constant 0 : index
      %46 = vector.load %arg9[%c0_39, %c0_40, %c0_41] : memref<3x1x16xf32, #tpu.memory_space<vmem>>, vector<3x1x16xf32>
      tpu.vector_store %arg9[%c0_39, %c0_40, %c0_41], %45 {strides = array<i32>} : memref<3x1x16xf32, #tpu.memory_space<vmem>>, vector<3x1x16xf32>,
      %cst_42 = arith.constant 0.000000e+00 : f32
      %47 = vector.broadcast %cst_42 : f32 to vector<3x1x16xf32>
      %c0_43 = arith.constant 0 : index
      %c0_44 = arith.constant 0 : index
      %c0_45 = arith.constant 0 : index
      %48 = vector.load %arg10[%c0_43, %c0_44, %c0_45] : memref<3x1x16xf32, #tpu.memory_space<vmem>>, vector<3x1x16xf32>
      tpu.vector_store %arg10[%c0_43, %c0_44, %c0_45], %47 {strides = array<i32>} : memref<3x1x16xf32, #tpu.memory_space<vmem>>, vector<3x1x16xf32>,
    } else {
    }
    %c0 = arith.constant 0 : index
    %c0_1 = arith.constant 0 : index
    %c0_2 = arith.constant 0 : index
    %c0_3 = arith.constant 0 : index
    %3 = vector.load %arg3[%c0, %c0_1, %c0_2, %c0_3] : memref<1x3x16x16xf32, #tpu.memory_space<vmem>>, vector<1x3x16x16xf32>
    %4 = vector.shape_cast %3 : vector<1x3x16x16xf32> to vector<3x16x16xf32>
    %c0_4 = arith.constant 0 : index
    %c0_5 = arith.constant 0 : index
    %c0_6 = arith.constant 0 : index
    %5 = vector.load %arg4[%c0_4, %c0_5, %c0_6] : memref<1x16x16xi32, #tpu.memory_space<vmem>>, vector<1x16x16xi32>
    %6 = vector.shape_cast %5 : vector<1x16x16xi32> to vector<16x16xi32>
    %cst = arith.constant dense<0xFF800000> : vector<16x16xf32>
    %7 = vector.multi_reduction <maximumf>, %4, %cst [0] : vector<3x16x16xf32> to vector<16x16xf32>
    %8 = vector.shape_cast %7 : vector<16x16xf32> to vector<1x16x16xf32>
    %9 = vector.broadcast %8 : vector<1x16x16xf32> to vector<3x16x16xf32>
    %10 = arith.subf %4, %9 : vector<3x16x16xf32>
    %11 = math.exp %10 : vector<3x16x16xf32>
    %cst_7 = arith.constant dense<0.000000e+00> : vector<16x16xf32>
    %12 = vector.multi_reduction <add>, %11, %cst_7 [0] : vector<3x16x16xf32> to vector<16x16xf32>
    %13 = vector.shape_cast %12 : vector<16x16xf32> to vector<1x16x16xf32>
    %14 = vector.broadcast %13 : vector<1x16x16xf32> to vector<3x16x16xf32>
    %15 = arith.divf %11, %14 : vector<3x16x16xf32>
    %16 = tpu.iota {dimensions = array<i32: 0>} : vector<3x16x16xi32>
    %17 = vector.shape_cast %6 : vector<16x16xi32> to vector<1x16x16xi32>
    %18 = vector.broadcast %17 : vector<1x16x16xi32> to vector<3x16x16xi32>
    %19 = arith.cmpi eq, %16, %18 : vector<3x16x16xi32>
    %c0_8 = arith.constant 0 : index
    %c0_9 = arith.constant 0 : index
    %c0_10 = arith.constant 0 : index
    %20 = vector.load %arg8[%c0_8, %c0_9, %c0_10] : memref<3x1x16xf32, #tpu.memory_space<vmem>>, vector<3x1x16xf32>
    %cst_11 = arith.constant 0.000000e+00 : f32
    %21 = vector.broadcast %cst_11 : f32 to vector<3x16x16xf32>
    %22 = arith.select %19, %15, %21 : vector<3x16x16xi1>, vector<3x16x16xf32>
    %cst_12 = arith.constant dense<0.000000e+00> : vector<3x16xf32>
    %23 = vector.multi_reduction <add>, %22, %cst_12 [1] : vector<3x16x16xf32> to vector<3x16xf32>
    %24 = vector.shape_cast %23 : vector<3x16xf32> to vector<3x1x16xf32>
    %25 = arith.addf %20, %24 : vector<3x1x16xf32>
    %c0_13 = arith.constant 0 : index
    %c0_14 = arith.constant 0 : index
    %c0_15 = arith.constant 0 : index
    %26 = vector.load %arg8[%c0_13, %c0_14, %c0_15] : memref<3x1x16xf32, #tpu.memory_space<vmem>>, vector<3x1x16xf32>
    tpu.vector_store %arg8[%c0_13, %c0_14, %c0_15], %25 {strides = array<i32>} : memref<3x1x16xf32, #tpu.memory_space<vmem>>, vector<3x1x16xf32>,
    %c0_16 = arith.constant 0 : index
    %c0_17 = arith.constant 0 : index
    %c0_18 = arith.constant 0 : index
    %27 = vector.load %arg10[%c0_16, %c0_17, %c0_18] : memref<3x1x16xf32, #tpu.memory_space<vmem>>, vector<3x1x16xf32>
    %cst_19 = arith.constant 1.000000e+00 : f32
    %cst_20 = arith.constant 0.000000e+00 : f32
    %28 = vector.broadcast %cst_19 : f32 to vector<3x16x16xf32>
    %29 = vector.broadcast %cst_20 : f32 to vector<3x16x16xf32>
    %30 = arith.select %19, %28, %29 : vector<3x16x16xi1>, vector<3x16x16xf32>
    %cst_21 = arith.constant dense<0.000000e+00> : vector<3x16xf32>
    %31 = vector.multi_reduction <add>, %30, %cst_21 [1] : vector<3x16x16xf32> to vector<3x16xf32>
    %32 = vector.shape_cast %31 : vector<3x16xf32> to vector<3x1x16xf32>
    %33 = arith.addf %27, %32 : vector<3x1x16xf32>
    %c0_22 = arith.constant 0 : index
    %c0_23 = arith.constant 0 : index
    %c0_24 = arith.constant 0 : index
    %34 = vector.load %arg10[%c0_22, %c0_23, %c0_24] : memref<3x1x16xf32, #tpu.memory_space<vmem>>, vector<3x1x16xf32>
    tpu.vector_store %arg10[%c0_22, %c0_23, %c0_24], %33 {strides = array<i32>} : memref<3x1x16xf32, #tpu.memory_space<vmem>>, vector<3x1x16xf32>,
    %c0_25 = arith.constant 0 : index
    %c0_26 = arith.constant 0 : index
    %c0_27 = arith.constant 0 : index
    %35 = vector.load %arg9[%c0_25, %c0_26, %c0_27] : memref<3x1x16xf32, #tpu.memory_space<vmem>>, vector<3x1x16xf32>
    %cst_28 = arith.constant dense<0.000000e+00> : vector<3x16xf32>
    %36 = vector.multi_reduction <add>, %15, %cst_28 [1] : vector<3x16x16xf32> to vector<3x16xf32>
    %37 = vector.shape_cast %36 : vector<3x16xf32> to vector<3x1x16xf32>
    %38 = arith.addf %35, %37 : vector<3x1x16xf32>
    %c0_29 = arith.constant 0 : index
    %c0_30 = arith.constant 0 : index
    %c0_31 = arith.constant 0 : index
    %39 = vector.load %arg9[%c0_29, %c0_30, %c0_31] : memref<3x1x16xf32, #tpu.memory_space<vmem>>, vector<3x1x16xf32>
    tpu.vector_store %arg9[%c0_29, %c0_30, %c0_31], %38 {strides = array<i32>} : memref<3x1x16xf32, #tpu.memory_space<vmem>>, vector<3x1x16xf32>,
    %c0_i32_32 = arith.constant 0 : i32
    %40 = arith.cmpi eq, %arg2, %c0_i32_32 : i32
    %41 = arith.extui %40 : i1 to i32
    %c0_i32_33 = arith.constant 0 : i32
    %42 = arith.cmpi ne, %41, %c0_i32_33 : i32
    scf.if %42 {
      %c0_34 = arith.constant 0 : index
      %c0_35 = arith.constant 0 : index
      %c0_36 = arith.constant 0 : index
      %43 = vector.load %arg8[%c0_34, %c0_35, %c0_36] : memref<3x1x16xf32, #tpu.memory_space<vmem>>, vector<3x1x16xf32>
      %cst_37 = arith.constant dense<0.000000e+00> : vector<3x1xf32>
      %44 = vector.multi_reduction <add>, %43, %cst_37 [2] : vector<3x1x16xf32> to vector<3x1xf32>
      %c0_38 = arith.constant 0 : index
      %c0_39 = arith.constant 0 : index
      %c0_40 = arith.constant 0 : index
      %c0_41 = arith.constant 0 : index
      %45 = vector.load %arg5[%c0_38, %c0_39, %c0_40, %c0_41] : memref<1x1x3x1xf32, #tpu.memory_space<vmem>>, vector<1x1x3x1xf32>
      %46 = vector.shape_cast %45 : vector<1x1x3x1xf32> to vector<3x1xf32>
      %47 = vector.shape_cast %44 : vector<3x1xf32> to vector<1x1x3x1xf32>
      tpu.vector_store %arg5[%c0_38, %c0_39, %c0_40, %c0_41], %47 {strides = array<i32>} : memref<1x1x3x1xf32, #tpu.memory_space<vmem>>, vector<1x1x3x1xf32>,
      %c0_42 = arith.constant 0 : index
      %c0_43 = arith.constant 0 : index
      %c0_44 = arith.constant 0 : index
      %48 = vector.load %arg9[%c0_42, %c0_43, %c0_44] : memref<3x1x16xf32, #tpu.memory_space<vmem>>, vector<3x1x16xf32>
      %cst_45 = arith.constant dense<0.000000e+00> : vector<3x1xf32>
      %49 = vector.multi_reduction <add>, %48, %cst_45 [2] : vector<3x1x16xf32> to vector<3x1xf32>
      %c0_46 = arith.constant 0 : index
      %c0_47 = arith.constant 0 : index
      %c0_48 = arith.constant 0 : index
      %c0_49 = arith.constant 0 : index
      %50 = vector.load %arg6[%c0_46, %c0_47, %c0_48, %c0_49] : memref<1x1x3x1xf32, #tpu.memory_space<vmem>>, vector<1x1x3x1xf32>
      %51 = vector.shape_cast %50 : vector<1x1x3x1xf32> to vector<3x1xf32>
      %52 = vector.shape_cast %49 : vector<3x1xf32> to vector<1x1x3x1xf32>
      tpu.vector_store %arg6[%c0_46, %c0_47, %c0_48, %c0_49], %52 {strides = array<i32>} : memref<1x1x3x1xf32, #tpu.memory_space<vmem>>, vector<1x1x3x1xf32>,
      %c0_50 = arith.constant 0 : index
      %c0_51 = arith.constant 0 : index
      %c0_52 = arith.constant 0 : index
      %53 = vector.load %arg10[%c0_50, %c0_51, %c0_52] : memref<3x1x16xf32, #tpu.memory_space<vmem>>, vector<3x1x16xf32>
      %cst_53 = arith.constant dense<0.000000e+00> : vector<3x1xf32>
      %54 = vector.multi_reduction <add>, %53, %cst_53 [2] : vector<3x1x16xf32> to vector<3x1xf32>
      %c0_54 = arith.constant 0 : index
      %c0_55 = arith.constant 0 : index
      %c0_56 = arith.constant 0 : index
      %c0_57 = arith.constant 0 : index
      %55 = vector.load %arg7[%c0_54, %c0_55, %c0_56, %c0_57] : memref<1x1x3x1xf32, #tpu.memory_space<vmem>>, vector<1x1x3x1xf32>
      %56 = vector.shape_cast %55 : vector<1x1x3x1xf32> to vector<3x1xf32>
      %57 = vector.shape_cast %54 : vector<3x1xf32> to vector<1x1x3x1xf32>
      tpu.vector_store %arg7[%c0_54, %c0_55, %c0_56, %c0_57], %57 {strides = array<i32>} : memref<1x1x3x1xf32, #tpu.memory_space<vmem>>, vector<1x1x3x1xf32>,
    } else {
    }
    return
  }
  func.func @transform_0(%arg0: i32, %arg1: i32, %arg2: i32) -> (i32, i32, i32, i32) {
    %c1_i32 = arith.constant 1 : i32
    %0 = arith.muli %arg0, %c1_i32 : i32
    %1 = arith.addi %0, %arg2 : i32
    %c0_i32 = arith.constant 0 : i32
    %c0_i32_0 = arith.constant 0 : i32
    %c0_i32_1 = arith.constant 0 : i32
    return %arg1, %c0_i32, %1, %c0_i32_0 : i32, i32, i32, i32
  }
  func.func @transform_1(%arg0: i32, %arg1: i32, %arg2: i32) -> (i32, i32, i32) {
    %c1_i32 = arith.constant 1 : i32
    %0 = arith.muli %arg0, %c1_i32 : i32
    %1 = arith.addi %0, %arg2 : i32
    %c0_i32 = arith.constant 0 : i32
    %c0_i32_0 = arith.constant 0 : i32
    return %arg1, %1, %c0_i32 : i32, i32, i32
  }
  func.func @transform_2(%arg0: i32, %arg1: i32, %arg2: i32) -> (i32, i32, i32, i32) {
    %c0_i32 = arith.constant 0 : i32
    %c0_i32_0 = arith.constant 0 : i32
    %c0_i32_1 = arith.constant 0 : i32
    return %arg0, %arg1, %c0_i32, %c0_i32_0 : i32, i32, i32, i32
  }
  func.func @transform_3(%arg0: i32, %arg1: i32, %arg2: i32) -> (i32, i32, i32, i32) {
    %c0_i32 = arith.constant 0 : i32
    %c0_i32_0 = arith.constant 0 : i32
    %c0_i32_1 = arith.constant 0 : i32
    return %arg0, %arg1, %c0_i32, %c0_i32_0 : i32, i32, i32, i32
  }
  func.func @transform_4(%arg0: i32, %arg1: i32, %arg2: i32) -> (i32, i32, i32, i32) {
    %c0_i32 = arith.constant 0 : i32
    %c0_i32_0 = arith.constant 0 : i32
    %c0_i32_1 = arith.constant 0 : i32
    return %arg0, %arg1, %c0_i32, %c0_i32_0 : i32, i32, i32, i32
  }
}

</mosaic_0001>

<bundles_post_ra>
// kernel: tpu_custom_call.1
= control target key start
LH: loop header
LB: loop body
LE: loop exit
PB: predicated region body
PF: predicated region fallthrough
CT: control target
= control target key end

     0   :  { %10 = vsyncpa [#allocation6], 0  ;;  %s1356_s0 = inlined_call_operand.hbm [shape: f32[2,3,16,16], index: 0, kind: input, shape index: {}]   ;;  %s1357_s1 = inlined_call_operand.hbm [shape: s32[2,16,16], index: 1, kind: input, shape index: {}]   ;;  %s1358_s2 = inlined_call_operand.vmem [shape: f32[1,2,3,1], index: 2, kind: output, shape index: {0}]   ;;  %s1359_s3 = inlined_call_operand.vmem [shape: f32[1,2,3,1], index: 3, kind: output, shape index: {1}]   ;;  %s1360_s4 = inlined_call_operand.vmem [shape: f32[1,2,3,1], index: 4, kind: output, shape index: {2}]  }
   0x1   :  { %12 = vsyncpa [#allocation6 + $0x1], 0 }
   0x2   :  { %13 = vsyncpa [#allocation8], 0 }
   0x3   :  { %15 = vsyncpa [#allocation8 + $0x1], 0  ;;  %s1070_s15 = smov 0   ;;  %s1072_s16 = smov 0  }
   0x4   :  { %s1074_s17 = smov 0   ;;  %s1076_s18 = smov 0  }
   0x5   :  { %s1078_s19 = smov 0   ;;  %s1080_s20 = smov 0  }
   0x6 LB: > { %s826_s21 = sadd.s32 4294967295, %s1038_s20   ;;  %s36_s22 = sadd.s32 1, %s1034_s19  ;;  %s1038_s20 = sphi %s1080_s20, %s21_s20   ;;  %s1034_s19 = sphi %s1078_s19, %s1370_s19   ;;  %s1030_s18 = sphi %s1076_s18, %s1369_s18   ;;  %s1026_s17 = sphi %s1074_s17, %s1368_s17   ;;  %s1022_s16 = sphi %s1072_s16, %s1367_s16   ;;  %s1018_s15 = sphi %s1070_s15, %s1366_s15  }
   0x7   : > { %p38_p0 = scmp.ge.s32.totalorder %s36_s22, 2  ;;  %s51_s23 = sadd.s32 1, %s1026_s17 }
   0x8   : > { %p58_p1 = scmp.ne.s32.totalorder %s1026_s17, %s1022_s16  ;;  %p59_p2 = scmp.eq.s32.totalorder %s1038_s20, 0 }
   0x9   : > { %s1372_s22 = smov (%p38_p0, %s36_s22), 0  ;;  %p64_p4 = scmp.ne.s32.totalorder %s1022_s16, %s1018_s15 }
   0xa   : > { %p60_p3 = por %p59_p2, %p58_p1  ;;  %s46_s24 = ssub.s32 %s1034_s19, %s1372_s22 }
   0xb   : > { %p65_p5 = scmp.eq.s32.totalorder %s826_s21, 0  ;;  %p49_p6 = scmp.eq.s32.totalorder %s46_s24, 0 }
   0xc   : > { %p856_p8 = scmp.lt.s32.totalorder %s1038_s20, 2  ;;  %s1118_s27 = sand.u32 1, %s1026_s17  }
   0xd   : > { %p1109_p7 = por %p65_p5, %p64_p4  ;;  %s843_s28 = smul.u32 768, %s1034_s19 }
   0xe   : > { %s1115_s26 = scalar_select %p49_p6, %s1026_s17, %s51_s23  }
   0xf   : > { %s1362_s25 = scalar_select %p1109_p7, 1, 0 }
  0x10   : > { %s842_s29 = smul.u32 48, %s1118_s27  ;;  %s1125_s6 = scalar_lea.hbm %s1356_s0, %s843_s28 }
  0x11   : > { %p1127_p9 = pnand %p856_p8, %p60_p3  ;;  %s203_s10 = scalar_lea.sflag [#allocation6], %s1118_s27 }
  0x12   : > { %s206_s8 = scalar_lea.vmem [#allocation5], %s842_s29  ;;  %s924_s11 = scalar_lea.hbm %s1125_s6, 768 }
  0x13   : > { %s216_s9 = sshll.u32 %s206_s8, 4  ;;  %p925_p10 = scmp.ne.s32.totalorder %s1125_s6, %s924_s11  ;;  %s1131_s9 = int_to_ptr.vmem [resolvable:$true] %s216_s9 }
  0x14   : > { %p926_p11 = pneg %p1127_p9  ;;  %s929_s14 = scalar_lea.hbm %s1356_s0, 1536 }
  0x15   : > { %p930_p0 = scmp.lt.u32.totalorder %s1125_s6, %s1356_s0  ;;  %p931_p1 = scmp.lt.u32.totalorder %s929_s14, %s924_s11 }
  0x16   : > { %p927_p12 = pnand %p926_p11, %p925_p10  ;;  %p933_p3 = scmp.lt.u32.totalorder %s924_s11, %s1125_s6 }
  0x17   : > { %p932_p2 = por %p931_p1, %p930_p0 }
  0x18   : > { %p928_p13 = pneg %p927_p12 }
  0x19   : > { %p934_p4 = por %p933_p3, %p932_p2 }
  0x1b   : > { %p935_p5 = pnand %p934_p4, %p928_p13 }
  0x1d   : > { %938 = shalt.err (!%p935_p5)
}
  0x1e   : > { %s939_s23 = scalar_lea.vmem %s1131_s9, 768  ;;  %s1040_s24 = smov [#allocation5]  }
  0x1f   : > { %p940_p6 = scmp.ne.s32.totalorder %s1131_s9, %s939_s23  ;;  %s944_s28 = sshll.u32 %s1040_s24, 4  ;;  %s945_s28 = int_to_ptr.vmem [resolvable:$false] %s944_s28 }
  0x20   : > { %s946_s29 = scalar_lea.vmem %s945_s28, 1536  ;;  %p947_p12 = scmp.lt.s32.totalorder %s1131_s9, %s945_s28 }
  0x21   : > { %p942_p8 = pnand %p940_p6, %p926_p11  ;;  %p948_p0 = scmp.lt.s32.totalorder %s946_s29, %s939_s23 }
  0x23   : > { %p943_p10 = pneg %p942_p8  ;;  %p949_p1 = por %p948_p0, %p947_p12 }
  0x25   : > { %p950_p2 = pnand %p949_p1, %p943_p10 }
  0x27   : > { %953 = shalt.err (!%p950_p2)
}
  0x28   : > { %s1041_s30 = smov 128   ;;  %s1042_s5 = smov 8  }
  0x29   : > { %852 = dma.hbm_to_vmem [thread:$0]  (!%p1127_p9), %s1125_s6, 768, %s1131_s9, %s203_s10, %s1041_s30, %s1041_s30, %s1042_s5  }
  0x2a   : > { %p834_p13 = scmp.ge.s32.totalorder %s1038_s20, 1  ;;  %p248_p3 = scmp.lt.s32.totalorder %s1038_s20, 3 }
  0x2b   : > { %s831_s8 = sshll.u32 %s1118_s27, 4  ;;  %s841_s12 = sshll.u32 %s1034_s19, 8 }
  0x2c   : > { %p1167_p4 = pnand %p834_p13, %p248_p3  ;;  %s230_s13 = scalar_lea.vmem [#allocation7], %s831_s8 }
  0x2d   : > { %s240_s14 = sshll.u32 %s230_s13, 4  ;;  %s1175_s23 = scalar_lea.hbm %s1357_s1, %s841_s12  ;;  %s1177_s14 = int_to_ptr.vmem [resolvable:$true] %s240_s14 }
  0x2e   : > { %s227_s6 = scalar_lea.sflag [#allocation8], %s1118_s27  ;;  %s954_s9 = scalar_lea.hbm %s1175_s23, 256 }
  0x2f   : > { %p955_p5 = scmp.ne.s32.totalorder %s1175_s23, %s954_s9  ;;  %s959_s28 = scalar_lea.hbm %s1357_s1, 512 }
  0x30   : > { %p960_p10 = scmp.lt.u32.totalorder %s1175_s23, %s1357_s1  ;;  %p961_p12 = scmp.lt.u32.totalorder %s959_s28, %s954_s9 }
  0x31   : > { %p957_p6 = pnand %p955_p5, %p926_p11  ;;  %p963_p1 = scmp.lt.u32.totalorder %s954_s9, %s1175_s23 }
  0x32   : > { %p962_p0 = por %p961_p12, %p960_p10 }
  0x33   : > { %p958_p8 = pneg %p957_p6 }
  0x34   : > { %p964_p2 = por %p963_p1, %p962_p0 }
  0x36   : > { %p965_p13 = pnand %p964_p2, %p958_p8 }
  0x38   : > { %968 = shalt.err (!%p965_p13)
}
  0x39   : > { %s969_s12 = scalar_lea.vmem %s1177_s14, 256  ;;  %s1043_s13 = smov [#allocation7]  }
  0x3a   : > { %p970_p3 = scmp.ne.s32.totalorder %s1177_s14, %s969_s12  ;;  %s974_s15 = sshll.u32 %s1043_s13, 4  ;;  %s975_s15 = int_to_ptr.vmem [resolvable:$false] %s974_s15 }
  0x3b   : > { %s976_s21 = scalar_lea.vmem %s975_s15, 512  ;;  %p977_p7 = scmp.lt.s32.totalorder %s1177_s14, %s975_s15 }
  0x3c   : > { %p972_p5 = pnand %p970_p3, %p926_p11  ;;  %p978_p10 = scmp.lt.s32.totalorder %s976_s21, %s969_s12 }
  0x3e   : > { %p973_p6 = pneg %p972_p5  ;;  %p979_p12 = por %p978_p10, %p977_p7 }
  0x40   : > { %p980_p0 = pnand %p979_p12, %p973_p6 }
  0x42   : > { %983 = shalt.err (!%p980_p0)
}
  0x43   : > { %855 = dma.hbm_to_vmem [thread:$0]  (!%p1127_p9), %s1175_s23, 256, %s1177_s14, %s227_s6, %s1041_s30, %s1041_s30, %s1042_s5  }
  0x44   : > { %252 = sbr.rel (%p1167_p4) target bundleno = 315 (0x13b), region = 28  ;;  %s254_s9 = sand.u32 (!%p1167_p4), 1, %s1022_s16  }
  0x45   : > { %s844_s10 = smul.u32 (!%p1167_p4), 48, %s254_s9  ;;  %s255_s24 = scalar_lea.sflag (!%p1167_p4), [#allocation6], %s254_s9 }
  0x46   : > { %p1365_p7 = scmp.ne.s32.totalorder (!%p1167_p4), %s1362_s25, 0 }
  0x47   : > { %s1211_s28 = scalar_lea.vmem (!%p1167_p4), [#allocation5], %s844_s10 }
  0x4b   : > { %1009 = dma.done.wait (%p1365_p7), %s255_s24, 768  }
  0x4c   : > { %1011 = vsyncadd (%p1365_p7), %s255_s24, 4294966528  ;;  %s835_s27 = sshll.u32 %s254_s9, 4  ;;  %s264_s7 = scalar_lea.sflag [#allocation8], %s254_s9 }
  0x4d   : > { %s267_s29 = scalar_lea.vmem [#allocation7], %s835_s27 }
  0x4e   : > { %1013 = dma.done.wait (%p1365_p7), %s264_s7, 256  }
  0x4f   : > { %1015 = vsyncadd (%p1365_p7), %s264_s7, 4294967040  ;;  %vm348_vm0 = vcmask 122880   ;;  %v1044_v0 = vmov 0.0   ;;  %v1230_v1 = vld [vmem:[%s267_s29] sm:$0xff]  ;;  %v1232_v2 = vld [vmem:[%s267_s29 + $0x8] sm:$0xff]  ;;  %vm366_vm1 = vcmask 130048  }
  0x50   : > { %356 = vst.msk [vmem:[#allocation4 + $0x1] sm:$0x1] %vm348_vm0, %v1044_v0  ;;  %349 = vst.msk [vmem:[#allocation2] sm:$0x1] %vm348_vm0, %v1044_v0  ;;  %vm415_vm2 = vcmp.eq.s32.totalorder %v1230_v1, 1  ;;  %vm416_vm3 = vcmp.eq.s32.totalorder %v1232_v2, 1 }
  0x51   : > { %350 = vst.msk [vmem:[#allocation2 + $0x1] sm:$0x1] %vm348_vm0, %v1044_v0  ;;  %351 = vst.msk [vmem:[#allocation2 + $0x2] sm:$0x1] %vm348_vm0, %v1044_v0  ;;  %vm417_vm4 = vcmp.eq.s32.totalorder %v1230_v1, 2  ;;  %vm418_vm5 = vcmp.eq.s32.totalorder %v1232_v2, 2 }
  0x52   : > { %352 = vst.msk [vmem:[#allocation3] sm:$0x1] %vm348_vm0, %v1044_v0  ;;  %353 = vst.msk [vmem:[#allocation3 + $0x1] sm:$0x1] %vm348_vm0, %v1044_v0  ;;  %v358_v3 = vld [vmem:[%s1211_s28] sm:$0xff]  ;;  %v467_v4 = vsel %vm415_vm2, 1.0, %v1044_v0 }
  0x53   : > { %354 = vst.msk [vmem:[#allocation3 + $0x2] sm:$0x1] %vm348_vm0, %v1044_v0  ;;  %355 = vst.msk [vmem:[#allocation4] sm:$0x1] %vm348_vm0, %v1044_v0  ;;  %v468_v5 = vsel %vm416_vm3, 1.0, %v1044_v0  ;;  %v469_v6 = vsel %vm417_vm4, 1.0, %v1044_v0 }
  0x54   : > { %357 = vst.msk [vmem:[#allocation4 + $0x2] sm:$0x1] %vm348_vm0, %v1044_v0  ;;  %v470_v7 = vsel %vm418_vm5, 1.0, %v1044_v0  ;;  %v480_v8 = vsel %vm366_vm1, %v467_v4, 0.0  ;;  %v481_v9 = vsel %vm366_vm1, %v468_v5, 0.0  ;;  %v489_v10 = vsel %vm366_vm1, %v469_v6, 0.0 }
  0x55   : > { %v490_v11 = vsel %vm366_vm1, %v470_v7, 0.0  ;;  %v359_v12 = vld [vmem:[%s1211_s28 + $0x8] sm:$0xff]  ;;  %v360_v13 = vld [vmem:[%s1211_s28 + $0x10] sm:$0xff]  ;;  %v482_v14 = vadd.f32 %v481_v9, %v480_v8  ;;  %v361_v16 = vld [vmem:[%s1211_s28 + $0x18] sm:$0xff]  ;;  %v367_v19 = vsel %vm366_vm1, %v358_v3, -inf  ;;  %vm413_vm6 = vcmp.eq.s32.totalorder %v1230_v1, 0 }
  0x56   : > { %v491_v15 = vadd.f32 %v490_v11, %v489_v10  ;;  %v362_v17 = vld [vmem:[%s1211_s28 + $0x20] sm:$0xff]  ;;  %v363_v18 = vld [vmem:[%s1211_s28 + $0x28] sm:$0xff]  ;;  %v368_v20 = vsel %vm366_vm1, %v360_v13, -inf  ;;  %v372_v22 = vsel %vm366_vm1, %v359_v12, -inf  ;;  %v373_v23 = vsel %vm366_vm1, %v361_v16, -inf  ;;  %p322_p9 = scmp.lt.s32.totalorder %s1030_s18, 1 }
  0x57   : > { %v369_v21 = vsel %vm366_vm1, %v362_v17, -inf  ;;  %v374_v24 = vsel %vm366_vm1, %v363_v18, -inf  ;;  %v483_v25 = vrot.slane %v482_v14, 4  ;;  %vm414_vm7 = vcmp.eq.s32.totalorder %v1232_v2, 0  ;;  %v463_v49 = vld [vmem:[#allocation4 + $0x1] sm:$0x1] }
  0x58   : > { %v492_v26 = vrot.slane %v491_v15, 4  ;;  %v370_v27 = vmax.f32 %v367_v19, %v369_v21  ;;  %v375_v28 = vmax.f32 %v372_v22, %v374_v24  ;;  %v465_v33 = vsel %vm413_vm6, 1.0, %v1044_v0  ;;  %s1374_s18 = smov (!%p322_p9, %s1030_s18), 1 }
  0x59   : > { %v484_v29 = vadd.f32 %v483_v25, %v482_v14  ;;  %v466_v34 = vsel %vm414_vm7, 1.0, %v1044_v0  ;;  %v471_v55 = vsel %vm366_vm1, %v465_v33, 0.0  ;;  %s836_s25 = sshll.u32 %s1374_s18, 2  ;;  %vm559_vm8 = vcmask 1041409  }
  0x5a   : > { %v493_v30 = vadd.f32 %v492_v26, %v491_v15  ;;  %v371_v31 = vmax.f32 %v370_v27, %v368_v20  ;;  %v376_v32 = vmax.f32 %v375_v28, %v373_v23  ;;  %v472_v56 = vsel %vm366_vm1, %v466_v34, 0.0  ;;  %s335_s11 = scalar_lea.vmem %s1359_s3, %s836_s25  ;;  %s327_s23 = scalar_lea.vmem %s1358_s2, %s836_s25 }
  0x5b   : > { %v485_v35 = vrot.slane %v484_v29, 2  ;;  %v464_v53 = vld [vmem:[#allocation4 + $0x2] sm:$0x1]  ;;  %v473_v59 = vadd.f32 %v472_v56, %v471_v55  ;;  %vm562_vm9 = vcmask 1042434   ;;  %vm565_vm10 = vcmask 2048   ;;  %s343_s12 = scalar_lea.vmem %s1360_s4, %s836_s25 }
  0x5c   : > { %v494_v36 = vrot.slane %v493_v30, 2  ;;  %v377_v37 = vsub.f32 %v358_v3, %v371_v31  ;;  %v378_v38 = vsub.f32 %v359_v12, %v376_v32  ;;  %v379_v39 = vsub.f32 %v360_v13, %v371_v31 }
  0x5d   : > { %v380_v40 = vsub.f32 %v361_v16, %v376_v32  ;;  %v381_v41 = vsub.f32 %v362_v17, %v371_v31  ;;  %v382_v42 = vsub.f32 %v363_v18, %v376_v32  ;;  %v486_v43 = vadd.f32 %v485_v35, %v484_v29  ;;  %v462_v18 = vld [vmem:[#allocation4] sm:$0x1] }
  0x5e   : > { %v495_v44 = vadd.f32 %v494_v36, %v493_v30  ;;  %v383_v45 = vmul.f32 1.442695, %v377_v37  ;;  %v385_v46 = vmul.f32 1.442695, %v378_v38  ;;  %v387_v47 = vmul.f32 1.442695, %v379_v39 }
  0x5f   : > { %v389_v48 = vmul.f32 1.442695, %v380_v40  ;;  %v487_v50 = vrot.slane %v486_v43, 1  ;;  %v391_v52 = vmul.f32 1.442695, %v381_v41  ;;  %v474_v62 = vrot.slane %v473_v59, 4 }
  0x60   : > { %v496_v51 = vrot.slane %v495_v44, 1  ;;  %908 = vpow2.f32 %v383_v45  ;;  %v393_v54 = vmul.f32 1.442695, %v382_v42 }
  0x61   : > { %910 = vpow2.f32 %v385_v46  ;;  %v488_v57 = vadd.f32 %v487_v50, %v486_v43  ;;  %v475_v63 = vadd.f32 %v474_v62, %v473_v59 }
  0x62   : > { %v497_v58 = vadd.f32 %v496_v51, %v495_v44  ;;  %912 = vpow2.f32 %v387_v47 }
  0x63   : > { %914 = vpow2.f32 %v389_v48  ;;  %v499_v60 = vadd.f32 %v488_v57, %v463_v49  ;;  %v476_v0 = vrot.slane %v475_v63, 2 }
  0x64   : > { %v500_v61 = vadd.f32 %v497_v58, %v464_v53  ;;  %916 = vpow2.f32 %v391_v52 }
  0x65   : > { %918 = vpow2.f32 %v393_v54  ;;  %502 = vst.msk [vmem:[#allocation4 + $0x1] sm:$0x1] %vm348_vm0, %v499_v60  ;;  %v477_v4 = vadd.f32 %v476_v0, %v475_v63 }
  0x66   : > { %503 = vst.msk [vmem:[#allocation4 + $0x2] sm:$0x1] %vm348_vm0, %v500_v61 }
  0x67   : > { %v478_v9 = vrot.slane %v477_v4, 1 }
  0x69   : > { %v479_v22 = vadd.f32 %v478_v9, %v477_v4 }
  0x6a   : > { %v909_v3 = vpop.eup %908 }
  0x6b   : > { %v911_v5 = vpop.eup %910  ;;  %v395_v6 = vsel %vm366_vm1, %v909_v3, 0.0  ;;  %v498_v27 = vadd.f32 %v479_v22, %v462_v18 }
  0x6c   : > { %v913_v7 = vpop.eup %912  ;;  %v400_v8 = vsel %vm366_vm1, %v911_v5, 0.0  ;;  %v589_v11 = vld [vmem:[#allocation4 + $0x1] sm:$0x1] }
  0x6d   : > { %v915_v10 = vpop.eup %914  ;;  %v590_v12 = vld [vmem:[#allocation4 + $0x2] sm:$0x1]  ;;  %v396_v13 = vsel %vm366_vm1, %v913_v7, 0.0  ;;  %v594_v15 = vsel %vm348_vm0, %v589_v11, 0.0  ;;  %501 = vst.msk [vmem:[#allocation4] sm:$0x1] %vm348_vm0, %v498_v27 }
  0x6e   : > { %v917_v14 = vpop.eup %916  ;;  %v397_v16 = vadd.f32 %v396_v13, %v395_v6  ;;  %v401_v17 = vsel %vm366_vm1, %v915_v10, 0.0  ;;  %595 = vadd.xlane.f32.xlu1 %v594_v15  ;;  %v597_v23 = vsel %vm348_vm0, %v590_v12, 0.0  ;;  %v504_v27 = vld [vmem:[#allocation3] sm:$0x1] }
  0x6f   : > { %v919_v19 = vpop.eup %918  ;;  %v398_v20 = vsel %vm366_vm1, %v917_v14, 0.0  ;;  %v402_v21 = vadd.f32 %v401_v17, %v400_v8 }
  0x70   : > { %v399_v24 = vadd.f32 %v398_v20, %v397_v16  ;;  %v403_v25 = vsel %vm366_vm1, %v919_v19, 0.0 }
  0x71   : > { %v404_v26 = vadd.f32 %v403_v25, %v402_v21  ;;  %v506_v21 = vld [vmem:[#allocation3 + $0x2] sm:$0x1]  ;;  %v421_v25 = vld [vmem:[#allocation2 + $0x2] sm:$0x1] }
  0x72   : > { %920 = vrcp.f32 %v399_v24  ;;  %598 = vadd.xlane.f32.xlu1 %v597_v23 }
  0x73   : > { %922 = vrcp.f32 %v404_v26 }
  0x7c   : > { %v921_v28 = vpop.eup %920 }
  0x7d   : > { %v923_v29 = vpop.eup %922  ;;  %v409_v30 = vmul.f32 %v921_v28, %v913_v7  ;;  %v411_v31 = vmul.f32 %v921_v28, %v917_v14  ;;  %v406_v32 = vmul.f32 %v921_v28, %v909_v3 }
  0x7e   : > { %v410_v33 = vmul.f32 %v923_v29, %v915_v10  ;;  %v412_v34 = vmul.f32 %v923_v29, %v919_v19  ;;  %v408_v35 = vmul.f32 %v923_v29, %v911_v5  ;;  %v505_v19 = vld [vmem:[#allocation3 + $0x1] sm:$0x1] }
  0x7f   : > { %v516_v36 = vsel %vm366_vm1, %v409_v30, 0.0  ;;  %v426_v37 = vsel %vm417_vm4, %v411_v31, 0.0  ;;  %v525_v38 = vsel %vm366_vm1, %v411_v31, 0.0  ;;  %v507_v39 = vsel %vm366_vm1, %v406_v32, 0.0 }
  0x80   : > { %v517_v40 = vsel %vm366_vm1, %v410_v33, 0.0  ;;  %v427_v41 = vsel %vm418_vm5, %v412_v34, 0.0  ;;  %v446_v42 = vsel %vm366_vm1, %v426_v37, 0.0  ;;  %v526_v43 = vsel %vm366_vm1, %v412_v34, 0.0  ;;  %v420_v34 = vld [vmem:[#allocation2 + $0x1] sm:$0x1] }
  0x81   : > { %v518_v44 = vadd.f32 %v517_v40, %v516_v36  ;;  %v447_v45 = vsel %vm366_vm1, %v427_v41, 0.0  ;;  %v527_v46 = vadd.f32 %v526_v43, %v525_v38  ;;  %v508_v47 = vsel %vm366_vm1, %v408_v35, 0.0  ;;  %v419_v41 = vld [vmem:[#allocation2] sm:$0x1] }
  0x82   : > { %v448_v48 = vadd.f32 %v447_v45, %v446_v42  ;;  %v509_v49 = vadd.f32 %v508_v47, %v507_v39  ;;  %v424_v50 = vsel %vm415_vm2, %v409_v30, 0.0  ;;  %v425_v51 = vsel %vm416_vm3, %v410_v33, 0.0 }
  0x83   : > { %v519_v52 = vrot.slane %v518_v44, 4  ;;  %v528_v53 = vrot.slane %v527_v46, 4  ;;  %v437_v54 = vsel %vm366_vm1, %v424_v50, 0.0  ;;  %v438_v55 = vsel %vm366_vm1, %v425_v51, 0.0 }
  0x84   : > { %v449_v56 = vrot.slane %v448_v48, 4  ;;  %v510_v57 = vrot.slane %v509_v49, 4  ;;  %v439_v58 = vadd.f32 %v438_v55, %v437_v54  ;;  %v422_v59 = vsel %vm413_vm6, %v406_v32, 0.0 }
  0x85   : > { %v520_v60 = vadd.f32 %v519_v52, %v518_v44  ;;  %v529_v61 = vadd.f32 %v528_v53, %v527_v46  ;;  %v423_v62 = vsel %vm414_vm7, %v408_v35, 0.0  ;;  %v428_v63 = vsel %vm366_vm1, %v422_v59, 0.0 }
  0x86   : > { %v450_v0 = vadd.f32 %v449_v56, %v448_v48  ;;  %v511_v3 = vadd.f32 %v510_v57, %v509_v49  ;;  %v440_v4 = vrot.slane %v439_v58, 4  ;;  %v429_v5 = vsel %vm366_vm1, %v423_v62, 0.0  ;;  %v588_v56 = vld [vmem:[#allocation4] sm:$0x1] }
  0x87   : > { %v521_v6 = vrot.slane %v520_v60, 2  ;;  %v530_v7 = vrot.slane %v529_v61, 2  ;;  %v430_v8 = vadd.f32 %v429_v5, %v428_v63  ;;  %v591_v57 = vsel %vm348_vm0, %v588_v56, 0.0 }
  0x88   : > { %v451_v9 = vrot.slane %v450_v0, 2  ;;  %v512_v10 = vrot.slane %v511_v3, 2  ;;  %v441_v11 = vadd.f32 %v440_v4, %v439_v58 }
  0x89   : > { %v522_v1 = vadd.f32 %v521_v6, %v520_v60  ;;  %v531_v12 = vadd.f32 %v530_v7, %v529_v61  ;;  %v431_v13 = vrot.slane %v430_v8, 4 }
  0x8a   : > { %v452_v14 = vadd.f32 %v451_v9, %v450_v0  ;;  %v513_v15 = vadd.f32 %v512_v10, %v511_v3  ;;  %v442_v2 = vrot.slane %v441_v11, 2 }
  0x8b   : > { %v523_v16 = vrot.slane %v522_v1, 1  ;;  %v532_v17 = vrot.slane %v531_v12, 1  ;;  %v432_v18 = vadd.f32 %v431_v13, %v430_v8 }
  0x8c   : > { %v453_v20 = vrot.slane %v452_v14, 1  ;;  %v514_v22 = vrot.slane %v513_v15, 1  ;;  %v443_v23 = vadd.f32 %v442_v2, %v441_v11 }
  0x8d   : > { %v524_v24 = vadd.f32 %v523_v16, %v522_v1  ;;  %v533_v26 = vadd.f32 %v532_v17, %v531_v12  ;;  %v433_v28 = vrot.slane %v432_v18, 2 }
  0x8e   : > { %v454_v29 = vadd.f32 %v453_v20, %v452_v14  ;;  %v515_v30 = vadd.f32 %v514_v22, %v513_v15  ;;  %v444_v31 = vrot.slane %v443_v23, 1 }
  0x8f   : > { %v535_v32 = vadd.f32 %v524_v24, %v505_v19  ;;  %v536_v33 = vadd.f32 %v533_v26, %v506_v21  ;;  %v434_v35 = vadd.f32 %v433_v28, %v432_v18 }
  0x90   : > { %v457_v36 = vadd.f32 %v454_v29, %v421_v25  ;;  %v534_v37 = vadd.f32 %v515_v30, %v504_v27  ;;  %v445_v38 = vadd.f32 %v444_v31, %v443_v23 }
  0x91   : > { %538 = vst.msk [vmem:[#allocation3 + $0x1] sm:$0x1] %vm348_vm0, %v535_v32  ;;  %539 = vst.msk [vmem:[#allocation3 + $0x2] sm:$0x1] %vm348_vm0, %v536_v33  ;;  %v435_v39 = vrot.slane %v434_v35, 1 }
  0x92   : > { %461 = vst.msk [vmem:[#allocation2 + $0x2] sm:$0x1] %vm348_vm0, %v457_v36  ;;  %537 = vst.msk [vmem:[#allocation3] sm:$0x1] %vm348_vm0, %v534_v37  ;;  %v456_v40 = vadd.f32 %v445_v38, %v420_v34 }
  0x93   : > { %v436_v42 = vadd.f32 %v435_v39, %v434_v35 }
  0x94   : > { %460 = vst.msk [vmem:[#allocation2 + $0x1] sm:$0x1] %vm348_vm0, %v456_v40 }
  0x95   : > { %v455_v43 = vadd.f32 %v436_v42, %v419_v41 }
  0x97   : > { %459 = vst.msk [vmem:[#allocation2] sm:$0x1] %vm348_vm0, %v455_v43 }
  0x98   : > { %v568_v44 = vld [vmem:[#allocation3 + $0x1] sm:$0x1]  ;;  %v569_v45 = vld [vmem:[#allocation3 + $0x2] sm:$0x1] }
  0x99   : > { %v573_v46 = vsel %vm348_vm0, %v568_v44, 0.0  ;;  %v545_v47 = vld [vmem:[#allocation2 + $0x2] sm:$0x1]  ;;  %v567_v48 = vld [vmem:[#allocation3] sm:$0x1]  ;;  %v576_v50 = vsel %vm348_vm0, %v569_v45, 0.0 }
  0x9a   : > { %574 = vadd.xlane.f32.xlu0 %v573_v46  ;;  %v552_v49 = vsel %vm348_vm0, %v545_v47, 0.0  ;;  %v570_v51 = vsel %vm348_vm0, %v567_v48, 0.0 }
  0x9b   : > { %553 = vadd.xlane.f32.xlu1 %v552_v49  ;;  %v544_v52 = vld [vmem:[#allocation2 + $0x1] sm:$0x1] }
  0x9c   : > { %v549_v53 = vsel %vm348_vm0, %v544_v52, 0.0 }
  0x9e   : > { %577 = vadd.xlane.f32.xlu0 %v576_v50  ;;  %v543_v54 = vld [vmem:[#allocation2] sm:$0x1] }
  0x9f   : > { %571 = vadd.xlane.f32.xlu1 %v570_v51  ;;  %v546_v55 = vsel %vm348_vm0, %v543_v54, 0.0 }
  0xa2   : > { %550 = vadd.xlane.f32.xlu0 %v549_v53 }
  0xa6   : > { %547 = vadd.xlane.f32.xlu0 %v546_v55 }
  0xaa   : > { %592 = vadd.xlane.f32.xlu0 %v591_v57 }
  0xfb   : > { %v596_v58 = vpop.xlane.xlu1 %595 }
  0xfc   : > { %v603_v1 = vrot.slane %v596_v58, 7 }
  0xff   : > { %v599_v59 = vpop.xlane.xlu1 %598 }
 0x100   : > { %v605_v12 = vrot.slane %v599_v59, 6 }
 0x127   : > { %v575_v60 = vpop.xlane.xlu0 %574 }
 0x128   : > { %v554_v61 = vpop.xlane.xlu1 %553  ;;  %v582_v62 = vrot.slane %v575_v60, 7 }
 0x129   : > { %v561_v7 = vrot.slane %v554_v61, 6 }
 0x12b   : > { %v578_v63 = vpop.xlane.xlu0 %577 }
 0x12c   : > { %v584_v0 = vrot.slane %v578_v63, 6  ;;  %v572_v3 = vpop.xlane.xlu1 %571 }
 0x12d   : > { %v583_v4 = vsel %vm559_vm8, %v582_v62, %v572_v3 }
 0x12e   : > { %v585_v5 = vsel %vm562_vm9, %v584_v0, %v583_v4 }
 0x12f   : > { %587 = vst.msk [vmem:[%s335_s11] sm:$0x7] %vm565_vm10, %v585_v5  ;;  %v551_v6 = vpop.xlane.xlu0 %550 }
 0x130   : > { %v558_v8 = vrot.slane %v551_v6, 7 }
 0x133   : > { %v548_v9 = vpop.xlane.xlu0 %547 }
 0x134   : > { %v560_v10 = vsel %vm559_vm8, %v558_v8, %v548_v9 }
 0x135   : > { %v563_v11 = vsel %vm562_vm9, %v561_v7, %v560_v10 }
 0x136   : > { %566 = vst.msk [vmem:[%s327_s23] sm:$0x7] %vm565_vm10, %v563_v11 }
 0x137   : > { %v593_v13 = vpop.xlane.xlu0 %592 }
 0x138   : > { %v604_v14 = vsel %vm559_vm8, %v603_v1, %v593_v13 }
 0x139   : > { %v606_v15 = vsel %vm562_vm9, %v605_v12, %v604_v14 }
 0x13a   : > { %608 = vst.msk [vmem:[%s343_s12] sm:$0x7] %vm565_vm10, %v606_v15 }
 0x13b PF: > { %s21_s20 = sadd.s32 1, %s1038_s20   ;;  %s1366_s15 = smov %s1022_s16 }
 0x13c   : > { %p18_p11 = scmp.ge.s32.totalorder %s21_s20, 4   ;;  %s1367_s16 = smov %s1026_s17 }
 0x13d   : > { %s1368_s17 = smov %s1115_s26  ;;  %s1369_s18 = smov %s1034_s19 }
 0x13e   : > { %s1370_s19 = smov %s1372_s22  ;;  %20 = sbr.rel (!%p18_p11) target bundleno = 6 (0x6), region = 113 }
 0x145   :  { %680 = vsyncpa [#allocation6], 1 }
 0x146   :  { %682 = vsyncpa [#allocation6 + $0x1], 1 }
 0x147   :  { %683 = vsyncpa [#allocation8], 1 }
 0x148   :  { %685 = vsyncpa [#allocation8 + $0x1], 1 }

</bundles_post_ra>
